<compile_context>
chip_gen: v7x
topology: tpu7x:2x2x1
jax: 0.10.0
libtpu: 0.0.40
codegen_flags: <defaults>
</compile_context>

<pallas_src>
import functools

import numpy as np
import jax
import jax.numpy as jnp
from jax.experimental import pallas as pl
from jax.experimental.pallas import tpu as pltpu

_NCORES = 2  # leading parallel axis of the reduce kernel (v7x has 2 TensorCores)

_CITYSCAPES_WEIGHTS = [0.8373, 0.918, 0.866, 1.0345, 1.0166, 0.9969, 0.9754,
                       1.0489, 0.8786, 1.0023, 0.9539, 0.9843, 1.1116, 0.9037,
                       1.0865, 1.0955, 1.0865, 1.1529, 1.0507]


# ---------------------------------------------------------------------------
# Kernel 1: per-pixel softmax prob / weighted NLL at the target class.
# pred_ref: (C, TP) native dtype, tgt_ref: (1, TP) int32, cw_ref: (C, 1) f32
# out_ref : (3, TP) f32  [prob ; nll*w*valid ; w*valid]
# ---------------------------------------------------------------------------
def _nll_kernel(ignore_index, pred_ref, tgt_ref, cw_ref, out_ref):
    logits = pred_ref[...].astype(jnp.float32)                  # (C, TP)
    tgt = tgt_ref[...]                                          # (1, TP) int32
    valid = tgt != ignore_index                                 # (1, TP) bool
    t = jnp.where(valid, tgt, 0)                                # clamp ignored -> class 0

    class_iota = jax.lax.broadcasted_iota(jnp.int32, logits.shape, 0)   # classes on sublanes
    onehot = (class_iota == t).astype(jnp.float32)              # (C, TP)

    m = jnp.max(logits, axis=0, keepdims=True)                  # (1, TP) sublane reduce (XLU)
    z = logits - m
    lse = jnp.log(jnp.sum(jnp.exp(z), axis=0, keepdims=True))   # (1, TP)
    gathered = jnp.sum(z * onehot, axis=0, keepdims=True)       # target logit (shifted)
    logp_t = gathered - lse                                     # log softmax at target
    p_t = jnp.exp(logp_t)                                       # softmax prob at target

    validf = valid.astype(jnp.float32)
    w = jnp.sum(onehot * cw_ref[...], axis=0, keepdims=True)    # class-weight gather
    wv = w * validf                                             # 0 for ignored / padded pixels

    out_ref[0:1, :] = jnp.where(valid, p_t, 1.0)                # masked_fill(~valid, 1)
    out_ref[1:2, :] = (-logp_t) * wv                            # pre-folded weighted NLL
    out_ref[2:3, :] = wv


# ---------------------------------------------------------------------------
# Kernel 2: fused keep-mask + masked weighted-mean reduction.
# thr_ref   : (1, 1) f32 in SMEM  (effective threshold; 2.0 disables OHEM)
# packed_ref: (3, TP) f32
# acc_ref   : (8, 128) f32 per-core accumulator block (row 0 = num, row 1 = den)
# ---------------------------------------------------------------------------
def _reduce_kernel(thr_ref, packed_ref, acc_ref):
    @pl.when(pl.program_id(1) == 0)
    def _():
        acc_ref[...] = jnp.zeros_like(acc_ref)

    thr = thr_ref[0, 0]
    tile = packed_ref[...]                                      # (3, TP)
    keep = (tile[0:1, :] <= thr).astype(jnp.float32)            # OHEM keep mask
    num_t = jnp.sum(tile[1:2, :] * keep)                        # sum nll*w over kept pixels
    den_t = jnp.sum(tile[2:3, :] * keep)                        # sum w     over kept pixels

    row = jax.lax.broadcasted_iota(jnp.int32, acc_ref.shape, 0)
    acc_ref[...] += (jnp.where(row == 0, num_t, 0.0) +
                     jnp.where(row == 1, den_t, 0.0))


# ---------------------------------------------------------------------------
# Module wrapper.
# ---------------------------------------------------------------------------
class OhemCrossEntropy2d:
    def __init__(self, ignore_index=-1, thresh=0.7, min_kept=100000,
                 use_weight=False, tile=8192, **kwargs):
        self.ignore_index = int(ignore_index)
        self.thresh = float(thresh)
        self.min_kept = int(min_kept)
        self.use_weight = bool(use_weight)
        self.tile = int(tile)
        self.class_weight = (jnp.asarray(_CITYSCAPES_WEIGHTS, dtype=jnp.float32)
                             if use_weight else None)

    def __call__(self, pred, target):
        n, c, h, w = pred.shape
        P = n * h * w

        # Pixel (lane) tile: multiple of 128, capped at the (128-padded) pixel count.
        tp = max(128, ((self.tile + 127) // 128) * 128)
        tp = min(tp, ((P + 127) // 128) * 128)
        # Pad so the tile count splits evenly across the reduce kernel's parallel axis.
        chunk = _NCORES * tp
        P_pad = ((P + chunk - 1) // chunk) * chunk
        n_tiles = P_pad // tp
        npc = n_tiles // _NCORES

        # Glue: NCHW -> (C, P) (cheap leading-axis transpose; pixel order matches
        # target.view(-1)).  Keep pred in its NATIVE dtype; the kernel upcasts to f32.
        pred2 = jnp.transpose(pred, (1, 0, 2, 3)).reshape(c, P)
        tgt2 = target.reshape(1, P).astype(jnp.int32)
        if P_pad != P:
            pred2 = jnp.pad(pred2, ((0, 0), (0, P_pad - P)))
            tgt2 = jnp.pad(tgt2, ((0, 0), (0, P_pad - P)),
                           constant_values=self.ignore_index)

        if self.class_weight is not None:
            assert c == self.class_weight.shape[0], "use_weight=True requires 19 classes"
            cw = self.class_weight.reshape(c, 1)
        else:
            cw = jnp.ones((c, 1), dtype=jnp.float32)

        # ---- Pass 1: packed per-pixel quantities -------------------------------
        kern = functools.partial(_nll_kernel, self.ignore_index)
        packed = pl.pallas_call(
            kern,
            out_shape=jax.ShapeDtypeStruct((3, P_pad), jnp.float32),
            grid_spec=pltpu.PrefetchScalarGridSpec(
                num_scalar_prefetch=0,
                grid=(n_tiles,),
                in_specs=[pl.BlockSpec((c, tp), lambda i: (0, i)),
                          pl.BlockSpec((1, tp), lambda i: (0, i)),
                          pl.BlockSpec((c, 1), lambda i: (0, 0))],
                out_specs=pl.BlockSpec((3, tp), lambda i: (0, i)),
            ),
            compiler_params=pltpu.CompilerParams(dimension_semantics=("parallel",)),
        )(pred2, tgt2, cw)

        # ---- OHEM threshold (scalar): top_k instead of a full sort -------------
        num_valid = jnp.sum((target.reshape(-1) != self.ignore_index).astype(jnp.int32))
        # TODO(synk): torch prints 'Lables: <num_valid>' when min_kept > num_valid;
        # that host-side print side-effect is omitted.
        if self.min_kept > 0:
            k = min(P, self.min_kept)
            prob_flat = packed[0, :P]
            neg_topk, _ = jax.lax.top_k(-prob_flat, k)   # k-th smallest = -(k-th largest of -p)
            kth = -neg_topk[k - 1]
            threshold = jnp.maximum(kth, jnp.float32(self.thresh))
        else:
            threshold = jnp.float32(self.thresh)

        apply_ohem = jnp.logical_and(num_valid >= self.min_kept, num_valid > 0)
        # Effective threshold 2.0 (> any softmax prob) keeps every valid pixel when the
        # OHEM branch is disabled, reproducing plain CrossEntropyLoss semantics.
        thr_eff = jnp.where(apply_ohem, threshold, jnp.float32(2.0)).astype(jnp.float32)
        thr_arr = thr_eff.reshape(1, 1)

        # ---- Pass 2: fused keep-mask + weighted-mean reduction ------------------
        acc = pl.pallas_call(
            _reduce_kernel,
            out_shape=jax.ShapeDtypeStruct((8, _NCORES * 128), jnp.float32),
            grid_spec=pltpu.PrefetchScalarGridSpec(
                num_scalar_prefetch=0,
                grid=(_NCORES, npc),
                in_specs=[pl.BlockSpec(memory_space=pltpu.MemorySpace.SMEM),
                          pl.BlockSpec((3, tp), lambda cc, i: (0, cc * npc + i))],
                out_specs=pl.BlockSpec((8, 128), lambda cc, i: (0, cc)),
            ),
            compiler_params=pltpu.CompilerParams(
                dimension_semantics=("parallel", "arbitrary")),
        )(thr_arr, packed)

        accr = acc.reshape(8, _NCORES, 128)
        num = jnp.sum(accr[0, :, 0])
        den = jnp.sum(accr[1, :, 0])
        # Guard the fully-ignored batch (PyTorch would yield NaN here).
        return jnp.where(den > 0, num / den, jnp.float32(0.0))


# ---------------------------------------------------------------------------
# Pure-JAX reference (mirrors the PyTorch forward) for a correctness check.
# ---------------------------------------------------------------------------
def _reference_loss(pred, target, ignore_index, thresh, min_kept, class_weight):
    n, c, h, w = pred.shape
    t = target.reshape(-1)
    valid = t != ignore_index
    tc = jnp.where(valid, t, 0)
    num_valid = jnp.sum(valid)

    logits = jnp.transpose(pred, (0, 2, 3, 1)).reshape(-1, c).astype(jnp.float32)
    logp = jax.nn.log_softmax(logits, axis=-1)
    idx = jnp.arange(logits.shape[0])
    logp_t = logp[idx, tc]
    p_t = jnp.exp(logp_t)
    mask_prob = jnp.where(valid, p_t, 1.0)

    P = logits.shape[0]
    if min_kept > 0:
        kth = jnp.sort(mask_prob)[min(P, min_kept) - 1]
        threshold = jnp.maximum(kth, jnp.float32(thresh))
    else:
        threshold = jnp.float32(thresh)
    apply_ohem = jnp.logical_and(num_valid >= min_kept, num_valid > 0)
    kept = mask_prob <= threshold
    final = jnp.where(apply_ohem, jnp.logical_and(valid, kept), valid).astype(jnp.float32)

    wpix = class_weight[tc]
    num = jnp.sum(-logp_t * final * wpix)
    den = jnp.sum(final * wpix)
    return jnp.where(den > 0, num / den, jnp.float32(0.0))


if __name__ == "__main__":
    key = jax.random.PRNGKey(0)
    N, H, W = 2, 16, 16

    def make_inputs(subkey, C):
        k1, k2, k3 = jax.random.split(subkey, 3)
        pred = jax.random.normal(k1, (N, C, H, W), dtype=jnp.float32)
        target = jax.random.randint(k2, (N, H, W), 0, C, dtype=jnp.int32)
        ignore_mask = jax.random.uniform(k3, (N, H, W)) < 0.1
        target = jnp.where(ignore_mask, -1, target)
        return pred, target

    kA, kB, kC = jax.random.split(key, 3)

    # Case 1: unweighted, OHEM active (min_kept <= num_valid).
    pred, target = make_inputs(kA, 4)
    loss = jax.block_until_ready(
        OhemCrossEntropy2d(ignore_index=-1, thresh=0.7, min_kept=100)(pred, target))
    ref = _reference_loss(pred, target, -1, 0.7, 100, jnp.ones((4,), jnp.float32))
    np.testing.assert_allclose(np.asarray(loss), np.asarray(ref), rtol=1e-5, atol=1e-5)

    # Case 2: Cityscapes class weights (19 classes), OHEM active.
    pred, target = make_inputs(kB, 19)
    loss = jax.block_until_ready(
        OhemCrossEntropy2d(ignore_index=-1, thresh=0.7, min_kept=150,
                           use_weight=True)(pred, target))
    ref = _reference_loss(pred, target, -1, 0.7, 150,
                          jnp.asarray(_CITYSCAPES_WEIGHTS, jnp.float32))
    np.testing.assert_allclose(np.asarray(loss), np.asarray(ref), rtol=1e-5, atol=1e-5)

    # Case 3: min_kept > num_valid -> OHEM disabled, plain (masked) CE mean.
    pred, target = make_inputs(kC, 4)
    loss = jax.block_until_ready(
        OhemCrossEntropy2d(ignore_index=-1, thresh=0.7, min_kept=100000)(pred, target))
    ref = _reference_loss(pred, target, -1, 0.7, 100000, jnp.ones((4,), jnp.float32))
    np.testing.assert_allclose(np.asarray(loss), np.asarray(ref), rtol=1e-5, atol=1e-5)

    print("KERNEL_OK")
</pallas_src>

<mosaic_0001>
module attributes {stable_mosaic.version = 11 : i64} {
  func.func @_nll_kernel(%arg0: i32, %arg1: memref<4x512xf32, #tpu.memory_space<vmem>>, %arg2: memref<1x512xi32, #tpu.memory_space<vmem>>, %arg3: memref<4x1xf32, #tpu.memory_space<vmem>>, %arg4: memref<3x512xf32, #tpu.memory_space<vmem>>) attributes {dimension_semantics = [#tpu.dimension_semantics<parallel>], iteration_bounds = array<i64: 2>, scalar_prefetch = 0 : i64, scratch_operands = 0 : i64, tpu.core_type = #tpu.core_type<tc>, window_params = [{transform_indices = @transform_0, window_bounds = array<i64: 4, 512>}, {transform_indices = @transform_1, window_bounds = array<i64: 1, 512>}, {pipeline_mode = #tpu.pipeline_mode<synchronous>, transform_indices = @transform_2, window_bounds = array<i64: 4, 1>}, {transform_indices = @transform_3, window_bounds = array<i64: 3, 512>}]} {
    %c0 = arith.constant 0 : index
    %c0_0 = arith.constant 0 : index
    %0 = vector.load %arg1[%c0, %c0_0] : memref<4x512xf32, #tpu.memory_space<vmem>>, vector<4x512xf32>
    %c0_1 = arith.constant 0 : index
    %c0_2 = arith.constant 0 : index
    %1 = vector.load %arg2[%c0_1, %c0_2] : memref<1x512xi32, #tpu.memory_space<vmem>>, vector<1x512xi32>
    %c-1_i32 = arith.constant -1 : i32
    %2 = vector.broadcast %c-1_i32 : i32 to vector<1x512xi32>
    %3 = arith.cmpi ne, %1, %2 : vector<1x512xi32>
    %c0_i32 = arith.constant 0 : i32
    %4 = vector.broadcast %c0_i32 : i32 to vector<1x512xi32>
    %5 = arith.select %3, %1, %4 : vector<1x512xi1>, vector<1x512xi32>
    %6 = tpu.iota {dimensions = array<i32: 0>} : vector<4x512xi32>
    %7 = vector.broadcast %5 : vector<1x512xi32> to vector<4x512xi32>
    %8 = arith.cmpi eq, %6, %7 : vector<4x512xi32>
    %9 = arith.extui %8 : vector<4x512xi1> to vector<4x512xi32>
    %10 = arith.sitofp %9 : vector<4x512xi32> to vector<4x512xf32>
    %cst = arith.constant dense<0xFF800000> : vector<512xf32>
    %11 = vector.multi_reduction <maximumf>, %0, %cst [0] : vector<4x512xf32> to vector<512xf32>
    %12 = vector.shape_cast %11 : vector<512xf32> to vector<1x512xf32>
    %13 = vector.broadcast %12 : vector<1x512xf32> to vector<4x512xf32>
    %14 = arith.subf %0, %13 : vector<4x512xf32>
    %15 = math.exp %14 : vector<4x512xf32>
    %cst_3 = arith.constant dense<0.000000e+00> : vector<512xf32>
    %16 = vector.multi_reduction <add>, %15, %cst_3 [0] : vector<4x512xf32> to vector<512xf32>
    %17 = vector.shape_cast %16 : vector<512xf32> to vector<1x512xf32>
    %18 = math.log %17 : vector<1x512xf32>
    %19 = arith.mulf %14, %10 : vector<4x512xf32>
    %cst_4 = arith.constant dense<0.000000e+00> : vector<512xf32>
    %20 = vector.multi_reduction <add>, %19, %cst_4 [0] : vector<4x512xf32> to vector<512xf32>
    %21 = vector.shape_cast %20 : vector<512xf32> to vector<1x512xf32>
    %22 = arith.subf %21, %18 : vector<1x512xf32>
    %23 = math.exp %22 : vector<1x512xf32>
    %24 = arith.extui %3 : vector<1x512xi1> to vector<1x512xi32>
    %25 = arith.sitofp %24 : vector<1x512xi32> to vector<1x512xf32>
    %c0_5 = arith.constant 0 : index
    %c0_6 = arith.constant 0 : index
    %26 = vector.load %arg3[%c0_5, %c0_6] : memref<4x1xf32, #tpu.memory_space<vmem>>, vector<4x1xf32>
    %27 = vector.broadcast %26 : vector<4x1xf32> to vector<4x512xf32>
    %28 = arith.mulf %10, %27 : vector<4x512xf32>
    %cst_7 = arith.constant dense<0.000000e+00> : vector<512xf32>
    %29 = vector.multi_reduction <add>, %28, %cst_7 [0] : vector<4x512xf32> to vector<512xf32>
    %30 = vector.shape_cast %29 : vector<512xf32> to vector<1x512xf32>
    %31 = arith.mulf %30, %25 : vector<1x512xf32>
    %cst_8 = arith.constant 1.000000e+00 : f32
    %32 = vector.broadcast %cst_8 : f32 to vector<1x512xf32>
    %33 = arith.select %3, %23, %32 : vector<1x512xi1>, vector<1x512xf32>
    %c0_9 = arith.constant 0 : index
    %c0_10 = arith.constant 0 : index
    %34 = vector.load %arg4[%c0_9, %c0_10] : memref<3x512xf32, #tpu.memory_space<vmem>>, vector<1x512xf32>
    tpu.vector_store %arg4[%c0_9, %c0_10], %33 {strides = array<i32>} : memref<3x512xf32, #tpu.memory_space<vmem>>, vector<1x512xf32>,
    %cst_11 = arith.constant 0.000000e+00 : f32
    %35 = vector.broadcast %cst_11 : f32 to vector<1x512xf32>
    %36 = arith.subf %35, %22 : vector<1x512xf32>
    %37 = arith.mulf %36, %31 : vector<1x512xf32>
    %c1 = arith.constant 1 : index
    %c0_12 = arith.constant 0 : index
    %38 = vector.load %arg4[%c1, %c0_12] : memref<3x512xf32, #tpu.memory_space<vmem>>, vector<1x512xf32>
    tpu.vector_store %arg4[%c1, %c0_12], %37 {strides = array<i32>} : memref<3x512xf32, #tpu.memory_space<vmem>>, vector<1x512xf32>,
    %c2 = arith.constant 2 : index
    %c0_13 = arith.constant 0 : index
    %39 = vector.load %arg4[%c2, %c0_13] : memref<3x512xf32, #tpu.memory_space<vmem>>, vector<1x512xf32>
    tpu.vector_store %arg4[%c2, %c0_13], %31 {strides = array<i32>} : memref<3x512xf32, #tpu.memory_space<vmem>>, vector<1x512xf32>,
    return
  }
  func.func @transform_0(%arg0: i32) -> (i32, i32) {
    %c0_i32 = arith.constant 0 : i32
    %c0_i32_0 = arith.constant 0 : i32
    return %c0_i32, %arg0 : i32, i32
  }
  func.func @transform_1(%arg0: i32) -> (i32, i32) {
    %c0_i32 = arith.constant 0 : i32
    %c0_i32_0 = arith.constant 0 : i32
    return %c0_i32, %arg0 : i32, i32
  }
  func.func @transform_2(%arg0: i32) -> (i32, i32) {
    %c0_i32 = arith.constant 0 : i32
    %c0_i32_0 = arith.constant 0 : i32
    %c0_i32_1 = arith.constant 0 : i32
    return %c0_i32, %c0_i32_0 : i32, i32
  }
  func.func @transform_3(%arg0: i32) -> (i32, i32) {
    %c0_i32 = arith.constant 0 : i32
    %c0_i32_0 = arith.constant 0 : i32
    return %c0_i32, %arg0 : i32, i32
  }
}

</mosaic_0001>

<bundles_post_ra>
// kernel: tpu_custom_call.1
= control target key start
LH: loop header
LB: loop body
LE: loop exit
PB: predicated region body
PF: predicated region fallthrough
CT: control target
= control target key end

     0   :  { %8 = vsyncpa [#allocation3], 0  ;;  %s1155_s0 = inlined_call_operand.hbm [shape: f32[4,1024], index: 0, kind: input, shape index: {}]   ;;  %s1156_s1 = inlined_call_operand.vmem [shape: s32[1,1024], index: 1, kind: input, shape index: {}]   ;;  %s1157_s2 = inlined_call_operand.vmem [shape: f32[4,1], index: 2, kind: input, shape index: {}]   ;;  %s1158_s3 = inlined_call_operand.hbm [shape: f32[3,1024], index: 3, kind: output, shape index: {}]  }
   0x1   :  { %10 = vsyncpa [#allocation3 + $0x1], 0 }
   0x2   :  { %11 = vsyncpa [#allocation4], 0 }
   0x3   :  { %13 = vsyncpa [#allocation4 + $0x1], 0  ;;  %s873_s12 = smov 0   ;;  %s875_s13 = smov 0  }
   0x4   :  { %s877_s14 = smov 0   ;;  %s879_s15 = smov 0  }
   0x5 LB: > { %s894_s16 = sadd.s32 4294967295, %s846_s15   ;;  %s654_s17 = sadd.s32 4294967294, %s846_s15   ;;  %s846_s15 = sphi %s879_s15, %s1175_s15   ;;  %s842_s14 = sphi %s877_s14, %s1174_s14   ;;  %s838_s13 = sphi %s875_s13, %s1173_s13   ;;  %s834_s12 = sphi %s873_s12, %s1172_s12  }
   0x6   : > { %s898_s18 = sadd.s32 1, %s846_s15   ;;  %s26_s19 = sadd.s32 1, %s842_s14 }
   0x7   : > { %s23_s20 = ssub.s32 %s846_s15, %s898_s18  ;;  %p33_p0 = scmp.ne.s32.totalorder %s842_s14, %s838_s13 }
   0x8   : > { %p24_p1 = scmp.eq.s32.totalorder %s23_s20, 0  ;;  %p34_p2 = scmp.eq.s32.totalorder %s846_s15, 0 }
   0x9   : > { %p39_p3 = scmp.ne.s32.totalorder %s838_s13, %s834_s12  ;;  %p40_p4 = scmp.eq.s32.totalorder %s894_s16, 0 }
   0xa   : > { %s910_s21 = scalar_select %p24_p1, %s842_s14, %s26_s19  }
   0xb   : > { %p912_p5 = por %p34_p2, %p33_p0  ;;  %p916_p6 = por %p40_p4, %p39_p3 }
   0xc   : > { %p110_p7 = scmp.eq.s32.totalorder %s894_s16, 1  ;;  %p116_p8 = scmp.eq.s32.totalorder %s654_s17, 1 }
   0xd   : > { %p690_p10 = scmp.lt.s32.totalorder %s846_s15, 2  ;;  %s139_s26 = sand.u32 1, %s842_s14  }
   0xe   : > { %p923_p11 = por %p110_p7, %p33_p0  ;;  %p927_p12 = por %p116_p8, %p39_p3 }
   0xf   : > { %s676_s27 = sshll.u32 %s846_s15, 8  ;;  %s657_s28 = sshll.u32 %s139_s26, 4 }
  0x10   : > { %s1162_s24 = scalar_select %p923_p11, 1, 0 }
  0x11   : > { %s1163_s25 = scalar_select %p927_p12, 1, 0 }
  0x12   : > { %s936_s4 = scalar_lea.hbm %s1155_s0, %s676_s27  ;;  %s143_s5 = scalar_lea.vmem [#allocation2], %s657_s28 }
  0x13   : > { %s151_s6 = sshll.u32 %s143_s5, 4  ;;  %p940_p13 = pnand %p690_p10, %p912_p5  ;;  %s944_s6 = int_to_ptr.vmem [resolvable:$true] %s151_s6 }
  0x14   : > { %s140_s8 = scalar_lea.sflag [#allocation3], %s139_s26  ;;  %s750_s9 = scalar_lea.hbm %s936_s4, 256 }
  0x15   : > { %p751_p2 = scmp.ne.s32.totalorder %s936_s4, %s750_s9  ;;  %p752_p3 = pneg %p940_p13 }
  0x16   : > { %s755_s17 = scalar_lea.hbm %s1155_s0, 512  ;;  %p756_p5 = scmp.lt.u32.totalorder %s936_s4, %s1155_s0 }
  0x17   : > { %p753_p4 = pnand %p752_p3, %p751_p2  ;;  %p757_p8 = scmp.lt.u32.totalorder %s755_s17, %s750_s9 }
  0x18   : > { %p759_p9 = scmp.lt.u32.totalorder %s750_s9, %s936_s4 }
  0x19   : > { %p754_p7 = pneg %p753_p4  ;;  %p758_p10 = por %p757_p8, %p756_p5 }
  0x1b   : > { %p760_p0 = por %p759_p9, %p758_p10 }
  0x1d   : > { %p761_p1 = pnand %p760_p0, %p754_p7 }
  0x1f   : > { %764 = shalt.err (!%p761_p1)
}
  0x20   : > { %s765_s22 = scalar_lea.vmem %s944_s6, 256  ;;  %s848_s26 = smov [#allocation2]  }
  0x21   : > { %p766_p2 = scmp.ne.s32.totalorder %s944_s6, %s765_s22  ;;  %s770_s27 = sshll.u32 %s848_s26, 4  ;;  %s771_s27 = int_to_ptr.vmem [resolvable:$false] %s770_s27 }
  0x22   : > { %s772_s28 = scalar_lea.vmem %s771_s27, 512  ;;  %p773_p11 = scmp.lt.s32.totalorder %s944_s6, %s771_s27 }
  0x23   : > { %p768_p4 = pnand %p766_p2, %p752_p3  ;;  %p774_p5 = scmp.lt.s32.totalorder %s772_s28, %s765_s22 }
  0x25   : > { %p769_p12 = pneg %p768_p4  ;;  %p775_p8 = por %p774_p5, %p773_p11 }
  0x27   : > { %p776_p9 = pnand %p775_p8, %p769_p12 }
  0x29   : > { %779 = shalt.err (!%p776_p9)
}
  0x2a   : > { %685 = dma.hbm_to_vmem [thread:$0]  (!%p940_p13), %s936_s4, 256, %s944_s6, %s140_s8  }
  0x2b   : > { %p1165_p0 = scmp.lt.s32.totalorder %s846_s15, 3  ;;  %p1166_p1 = scmp.ge.s32.totalorder %s846_s15, 1 }
  0x2d   : > { %p165_p3 = pnand %p1166_p1, %p1165_p0 }
  0x2e   : > { %s978_s29 = sand.u32 (!%p165_p3), 1, %s838_s13  }
  0x2f   : > { %168 = sbr.rel (%p165_p3) target bundleno = 226 (0xe2), region = 32  ;;  %s661_s30 = sshll.u32 (!%p165_p3), %s978_s29, 4 }
  0x30   : > { %s171_s5 = scalar_lea.sflag (!%p165_p3), [#allocation3], %s978_s29  ;;  %s174_s7 = scalar_lea.vmem (!%p165_p3), [#allocation2], %s661_s30 }
  0x36   : > { %825 = dma.done.wait (%p916_p6), %s171_s5, 256  }
  0x37   : > { %827 = vsyncadd (%p916_p6), %s171_s5, 4294967040  ;;  %s663_s4 = sshll.u32 %s894_s16, 2  ;;  %v849_v0 = vmov 0   ;;  %vm249_vm0 = vcmask 1043456   ;;  %v213_v1 = vlaneseq  ;;  %v392_v2 = vld [vmem:[%s1157_s2] sm:$0xf] }
  0x38   : > { %727 = vset.pattern.permute.xlu0 %v849_v0  ;;  %p203_p11 = scmp.lt.s32.totalorder %s663_s4, 7  ;;  %v208_v3 = vld [vmem:[%s174_s7] sm:$0xff]  ;;  %v209_v4 = vld [vmem:[%s174_s7 + $0x8] sm:$0xff]  ;;  %v850_v32 = vmov 0.0   ;;  %s1073_s23 = scalar_lea.vmem [#allocation5], %s661_s30 }
  0x39   : > { %395 = vperm.xlu0 %727, %v392_v2   ;;  %v245_v5 = vcombine.high %v208_v3, %v208_v3  ;;  %v246_v6 = vcombine.high %v209_v4, %v209_v4  ;;  %v250_v7 = vsel %vm249_vm0, %v208_v3, -inf  ;;  %v264_v8 = vsel %vm249_vm0, %v209_v4, -inf  ;;  %s677_s17 = sshll.u32 %s894_s16, 8  ;;  %s575_s19 = sshll.u32 %s1073_s23, 4  ;;  %s1107_s19 = int_to_ptr.vmem [resolvable:$true] %s575_s19 }
  0x3a   : > { %s1177_s4 = smov (!%p203_p11, %s663_s4), 7  ;;  %v251_v9 = vrot.slane %v250_v7, 4  ;;  %v265_v10 = vrot.slane %v264_v8, 4  ;;  %v998_v11 = vshrl.u32 %v213_v1, 7  ;;  %vm1067_vm6 = vcmp.lt.s32.totalorder %v213_v1, 512  ;;  %s1105_s26 = scalar_lea.hbm %s1158_s3, %s677_s17 }
  0x3b   : > { %s205_s11 = scalar_lea.vmem %s1156_s1, %s1177_s4  ;;  %v257_v13 = vsel %vm249_vm0, %v245_v5, -inf  ;;  %v271_v14 = vsel %vm249_vm0, %v246_v6, -inf  ;;  %s561_s16 = scalar_lea.sflag [#allocation4], %s978_s29 }
  0x3c   : > { %v1000_v12 = vld [vmem:[%s205_s11] sm:$0xf]  ;;  %v252_v15 = vmax.f32 %v250_v7, %v251_v9  ;;  %v258_v16 = vrot.slane %v257_v13, 4  ;;  %v266_v17 = vmax.f32 %v264_v8, %v265_v10  ;;  %v272_v18 = vrot.slane %v271_v14, 4  ;;  %s780_s27 = scalar_lea.vmem %s1107_s19, 256  ;;  %p1169_p12 = scmp.ne.s32.totalorder %s1162_s24, 0 }
  0x3d   : > { %vm211_vm1 = vcmp.ne.s32.totalorder %v1000_v12, 4294967295  ;;  %v217_v19 = vsub.s32 0, %v998_v11  ;;  %v221_v24 = vsub.s32 1, %v998_v11  ;;  %v225_v25 = vsub.s32 2, %v998_v11  ;;  %p781_p6 = scmp.ne.s32.totalorder %s1107_s19, %s780_s27  ;;  %s852_s28 = smov [#allocation5]  }
  0x3e   : > { %v253_v20 = vrot.slane %v252_v15, 2  ;;  %v259_v21 = vmax.f32 %v257_v13, %v258_v16  ;;  %v267_v22 = vrot.slane %v266_v17, 2  ;;  %v273_v23 = vmax.f32 %v271_v14, %v272_v18  ;;  %s784_s30 = sshll.u32 %s852_s28, 4  ;;  %s785_s30 = int_to_ptr.vmem [resolvable:$false] %s784_s30 }
  0x3f   : > { %v229_v26 = vsub.s32 3, %v998_v11  ;;  %v212_v27 = vsel %vm211_vm1, %v1000_v12, 0  ;;  %v668_v33 = vsel %vm211_vm1, 1.0, %v850_v32  ;;  %p782_p13 = pnand %p781_p6, %p1169_p12  ;;  %s786_s5 = scalar_lea.vmem %s785_s30, 512 }
  0x40   : > { %v254_v28 = vmax.f32 %v252_v15, %v253_v20  ;;  %v260_v29 = vrot.slane %v259_v21, 2  ;;  %v268_v30 = vmax.f32 %v266_v17, %v267_v22  ;;  %v274_v31 = vrot.slane %v273_v23, 2  ;;  %p787_p10 = scmp.lt.s32.totalorder %s1107_s19, %s785_s30  ;;  %p788_p2 = scmp.lt.s32.totalorder %s786_s5, %s780_s27 }
  0x41   : > { %v218_v38 = vrot.slane %v212_v27, %v217_v19  ;;  %v222_v39 = vrot.slane %v212_v27, %v221_v24  ;;  %v226_v40 = vrot.slane %v212_v27, %v225_v25  ;;  %v230_v41 = vrot.slane %v212_v27, %v229_v26  ;;  %p783_p7 = pneg %p782_p13 }
  0x42   : > { %v255_v34 = vrot.slane %v254_v28, 1  ;;  %v261_v35 = vmax.f32 %v259_v21, %v260_v29  ;;  %v269_v36 = vrot.slane %v268_v30, 1  ;;  %v275_v37 = vmax.f32 %v273_v23, %v274_v31  ;;  %p789_p4 = por %p788_p2, %p787_p10 }
  0x43   : > { %v1014_v46 = vrot.slane %v668_v33, %v217_v19  ;;  %v1016_v47 = vrot.slane %v668_v33, %v221_v24  ;;  %v1018_v48 = vrot.slane %v668_v33, %v225_v25  ;;  %v1020_v49 = vrot.slane %v668_v33, %v229_v26 }
  0x44   : > { %v256_v42 = vmax.f32 %v254_v28, %v255_v34  ;;  %v262_v43 = vrot.slane %v261_v35, 1  ;;  %v270_v44 = vmax.f32 %v268_v30, %v269_v36  ;;  %v276_v45 = vrot.slane %v275_v37, 1  ;;  %p790_p5 = pnand %p789_p4, %p783_p7 }
  0x45   : > { %vm231_vm2 = vcmp.eq.s32.totalorder %v998_v11, %v218_v38  ;;  %vm232_vm3 = vcmp.eq.s32.totalorder %v998_v11, %v222_v39  ;;  %vm233_vm4 = vcmp.eq.s32.totalorder %v998_v11, %v226_v40  ;;  %vm234_vm5 = vcmp.eq.s32.totalorder %v998_v11, %v230_v41 }
  0x46   : > { %v263_v50 = vmax.f32 %v261_v35, %v262_v43  ;;  %v277_v51 = vmax.f32 %v275_v37, %v276_v45  ;;  %v1026_v56 = vsel %vm231_vm2, 1.0, %v850_v32  ;;  %v1028_v57 = vsel %vm232_vm3, 1.0, %v850_v32 }
  0x47   : > { %v1030_v58 = vsel %vm233_vm4, 1.0, %v850_v32  ;;  %v1032_v59 = vsel %vm234_vm5, 1.0, %v850_v32  ;;  %v338_v62 = vcombine.low %v1026_v56, %v1028_v57 }
  0x48   : > { %v282_v52 = vcombine.low %v256_v42, %v263_v50  ;;  %v283_v53 = vcombine.low %v270_v44, %v277_v51  ;;  %v339_v63 = vcombine.low %v1030_v58, %v1032_v59 }
  0x4a   : > { %v286_v54 = vsub.f32 %v208_v3, %v282_v52  ;;  %v287_v55 = vsub.f32 %v209_v4, %v283_v53 }
  0x4c   : > { %v288_v60 = vmul.f32 1.442695, %v286_v54  ;;  %v290_v61 = vmul.f32 1.442695, %v287_v55  ;;  %v342_v0 = vmul.f32 %v338_v62, %v286_v54  ;;  %v343_v2 = vmul.f32 %v339_v63, %v287_v55 }
  0x4e   : > { %730 = vpow2.f32 %v288_v60  ;;  %v346_v3 = vcombine.high %v342_v0, %v342_v0  ;;  %v347_v4 = vcombine.high %v343_v2, %v343_v2  ;;  %v350_v6 = vsel %vm249_vm0, %v342_v0, 0.0 }
  0x4f   : > { %732 = vpow2.f32 %v290_v61  ;;  %v364_v10 = vsel %vm249_vm0, %v343_v2, 0.0  ;;  %v351_v19 = vrot.slane %v350_v6, 4 }
  0x50   : > { %v357_v16 = vsel %vm249_vm0, %v346_v3, 0.0  ;;  %v371_v20 = vsel %vm249_vm0, %v347_v4, 0.0  ;;  %v365_v24 = vrot.slane %v364_v10, 4 }
  0x51   : > { %v358_v27 = vrot.slane %v357_v16, 4  ;;  %v372_v30 = vrot.slane %v371_v20, 4  ;;  %v352_v33 = vadd.f32 %v351_v19, %v350_v6 }
  0x52   : > { %v366_v36 = vadd.f32 %v365_v24, %v364_v10 }
  0x53   : > { %v359_v39 = vadd.f32 %v358_v27, %v357_v16  ;;  %v373_v42 = vadd.f32 %v372_v30, %v371_v20  ;;  %v353_v45 = vrot.slane %v352_v33, 2  ;;  %v851_v30 = vmov 1966171168  }
  0x54   : > { %v367_v52 = vrot.slane %v366_v36, 2 }
  0x55   : > { %v360_v55 = vrot.slane %v359_v39, 2  ;;  %v374_v61 = vrot.slane %v373_v42, 2  ;;  %v354_v63 = vadd.f32 %v353_v45, %v352_v33 }
  0x56   : > { %v368_v0 = vadd.f32 %v367_v52, %v366_v36 }
  0x57   : > { %v361_v2 = vadd.f32 %v360_v55, %v359_v39  ;;  %v375_v3 = vadd.f32 %v374_v61, %v373_v42  ;;  %v355_v4 = vrot.slane %v354_v63, 1 }
  0x58   : > { %v731_v5 = vpop.eup %730 }
  0x59   : > { %v733_v7 = vpop.eup %732  ;;  %v294_v8 = vcombine.high %v731_v5, %v731_v5  ;;  %v298_v9 = vsel %vm249_vm0, %v731_v5, 0.0  ;;  %v369_v5 = vrot.slane %v368_v0, 1  ;;  %v362_v6 = vrot.slane %v361_v2, 1 }
  0x5a   : > { %v295_v13 = vcombine.high %v733_v7, %v733_v7  ;;  %v299_v14 = vrot.slane %v298_v9, 4  ;;  %v312_v15 = vsel %vm249_vm0, %v733_v7, 0.0  ;;  %v376_v7 = vrot.slane %v375_v3, 1 }
  0x5b   : > { %v305_v17 = vsel %vm249_vm0, %v294_v8, 0.0  ;;  %v313_v18 = vrot.slane %v312_v15, 4  ;;  %v356_v8 = vadd.f32 %v355_v4, %v354_v63  ;;  %v370_v10 = vadd.f32 %v369_v5, %v368_v0 }
  0x5c   : > { %v300_v21 = vadd.f32 %v299_v14, %v298_v9  ;;  %v306_v22 = vrot.slane %v305_v17, 4  ;;  %v319_v23 = vsel %vm249_vm0, %v295_v13, 0.0 }
  0x5d   : > { %v314_v25 = vadd.f32 %v313_v18, %v312_v15  ;;  %v320_v26 = vrot.slane %v319_v23, 4  ;;  %v363_v15 = vadd.f32 %v362_v6, %v361_v2  ;;  %v377_v18 = vadd.f32 %v376_v7, %v375_v3 }
  0x5e   : > { %v301_v28 = vrot.slane %v300_v21, 2  ;;  %v307_v29 = vadd.f32 %v306_v22, %v305_v17 }
  0x5f   : > { %v315_v31 = vrot.slane %v314_v25, 2  ;;  %v321_v32 = vadd.f32 %v320_v26, %v319_v23 }
  0x60   : > { %v302_v34 = vadd.f32 %v301_v28, %v300_v21  ;;  %v308_v35 = vrot.slane %v307_v29, 2 }
  0x61   : > { %v316_v37 = vadd.f32 %v315_v31, %v314_v25  ;;  %v322_v38 = vrot.slane %v321_v32, 2  ;;  %v462_v31 = vunpack.c.l.s4 %v851_v30 }
  0x62   : > { %v303_v40 = vrot.slane %v302_v34, 1  ;;  %v309_v41 = vadd.f32 %v308_v35, %v307_v29 }
  0x63   : > { %v317_v43 = vrot.slane %v316_v37, 1  ;;  %v323_v44 = vadd.f32 %v322_v38, %v321_v32  ;;  %v463_v32 = vunpack.c.0.s8 %v462_v31 }
  0x64   : > { %v304_v50 = vadd.f32 %v303_v40, %v302_v34  ;;  %v310_v51 = vrot.slane %v309_v41, 1 }
  0x65   : > { %v318_v53 = vadd.f32 %v317_v43, %v316_v37  ;;  %v324_v54 = vrot.slane %v323_v44, 1  ;;  %v1059_v35 = vsub.s32 %v463_v32, %v998_v11 }
  0x66   : > { %v311_v60 = vadd.f32 %v310_v51, %v309_v41  ;;  %734 = vlog2.f32 %v304_v50 }
  0x67   : > { %v325_v62 = vadd.f32 %v324_v54, %v323_v44  ;;  %736 = vlog2.f32 %v318_v53 }
  0x68   : > { %738 = vlog2.f32 %v311_v60 }
  0x69   : > { %740 = vlog2.f32 %v325_v62 }
  0x70   : > { %v735_v9 = vpop.eup %734 }
  0x71   : > { %v737_v13 = vpop.eup %736  ;;  %v327_v14 = vmul.f32 0.6931472, %v735_v9 }
  0x72   : > { %v739_v16 = vpop.eup %738  ;;  %v331_v17 = vmul.f32 0.6931472, %v737_v13 }
  0x73   : > { %v741_v19 = vpop.eup %740  ;;  %v329_v20 = vmul.f32 0.6931472, %v739_v16  ;;  %v1046_v21 = vsub.f32 %v356_v8, %v327_v14 }
  0x74   : > { %v333_v22 = vmul.f32 0.6931472, %v741_v19  ;;  %v1048_v23 = vsub.f32 %v370_v10, %v331_v17 }
  0x75   : > { %v1050_v24 = vsub.f32 %v363_v15, %v329_v20  ;;  %v382_v25 = vmul.f32 1.442695, %v1046_v21  ;;  %v490_v15 = vsub.f32 0.0, %v1046_v21 }
  0x76   : > { %v1053_v26 = vsub.f32 %v377_v18, %v333_v22  ;;  %v386_v27 = vmul.f32 1.442695, %v1048_v23  ;;  %v492_v17 = vsub.f32 0.0, %v1048_v23 }
  0x77   : > { %742 = vpow2.f32 %v382_v25  ;;  %v384_v28 = vmul.f32 1.442695, %v1050_v24  ;;  %v491_v16 = vsub.f32 0.0, %v1050_v24 }
  0x78   : > { %744 = vpow2.f32 %v386_v27  ;;  %v388_v29 = vmul.f32 1.442695, %v1053_v26  ;;  %v493_v18 = vsub.f32 0.0, %v1053_v26 }
  0x79   : > { %746 = vpow2.f32 %v384_v28 }
  0x7a   : > { %748 = vpow2.f32 %v388_v29 }
  0x81   : > { %v743_v33 = vpop.eup %742 }
  0x82   : > { %v745_v34 = vpop.eup %744 }
  0x83   : > { %v747_v36 = vpop.eup %746 }
  0x84   : > { %v749_v37 = vpop.eup %748  ;;  %v459_v38 = vcombine.low %v743_v33, %v747_v36 }
  0x85   : > { %v460_v39 = vcombine.low %v745_v34, %v749_v37 }
  0x86   : > { %v467_v40 = vrot.slane %v459_v38, %v1059_v35 }
  0x87   : > { %v474_v41 = vrot.slane %v460_v39, %v1059_v35 }
  0x89   : > { %v475_v42 = vcombine.low %v467_v40, %v474_v41 }
  0x8b   : > { %v482_v43 = vrot.slane %v475_v42, %v1059_v35 }
  0x8d   : > { %v484_v44 = vsel %vm211_vm1, %v482_v43, 1.0 }
  0x8e   : > { %489 = vst.msk [vmem:[%s1073_s23] ss:$4 sm:$0xf] %vm1067_vm6, %v484_v44 }
  0xb8   : > { %v396_v11 = vpop.permute.xlu0 %395 }
  0xb9   : > { %v398_v50 = vmul.f32 %v1026_v56, %v396_v11  ;;  %v399_v51 = vmul.f32 %v1028_v57, %v396_v11  ;;  %v400_v12 = vmul.f32 %v1030_v58, %v396_v11  ;;  %v401_v52 = vmul.f32 %v1032_v59, %v396_v11 }
  0xbb   : > { %v402_v1 = vsel %vm249_vm0, %v398_v50, 0.0  ;;  %v409_v53 = vsel %vm249_vm0, %v399_v51, 0.0  ;;  %v416_v54 = vsel %vm249_vm0, %v400_v12, 0.0  ;;  %v423_v55 = vsel %vm249_vm0, %v401_v52, 0.0 }
  0xbc   : > { %v403_v60 = vrot.slane %v402_v1, 4  ;;  %v410_v61 = vrot.slane %v409_v53, 4  ;;  %v417_v62 = vrot.slane %v416_v54, 4  ;;  %v424_v63 = vrot.slane %v423_v55, 4 }
  0xbe   : > { %v404_v0 = vadd.f32 %v403_v60, %v402_v1  ;;  %v411_v56 = vadd.f32 %v410_v61, %v409_v53  ;;  %v418_v2 = vadd.f32 %v417_v62, %v416_v54  ;;  %v425_v57 = vadd.f32 %v424_v63, %v423_v55 }
  0xc0   : > { %v405_v3 = vrot.slane %v404_v0, 2  ;;  %v412_v58 = vrot.slane %v411_v56, 2  ;;  %v419_v4 = vrot.slane %v418_v2, 2  ;;  %v426_v59 = vrot.slane %v425_v57, 2 }
  0xc2   : > { %v406_v5 = vadd.f32 %v405_v3, %v404_v0  ;;  %v413_v6 = vadd.f32 %v412_v58, %v411_v56  ;;  %v420_v7 = vadd.f32 %v419_v4, %v418_v2  ;;  %v427_v8 = vadd.f32 %v426_v59, %v425_v57 }
  0xc4   : > { %v407_v9 = vrot.slane %v406_v5, 1  ;;  %v414_v10 = vrot.slane %v413_v6, 1  ;;  %v421_v13 = vrot.slane %v420_v7, 1  ;;  %v428_v14 = vrot.slane %v427_v8, 1 }
  0xc6   : > { %v408_v19 = vadd.f32 %v407_v9, %v406_v5  ;;  %v415_v20 = vadd.f32 %v414_v10, %v413_v6  ;;  %v422_v22 = vadd.f32 %v421_v13, %v420_v7  ;;  %v429_v25 = vadd.f32 %v428_v14, %v427_v8 }
  0xc8   : > { %v451_v27 = vmul.f32 %v1014_v46, %v408_v19  ;;  %v452_v28 = vmul.f32 %v1016_v47, %v415_v20  ;;  %v453_v29 = vmul.f32 %v1018_v48, %v422_v22  ;;  %v454_v21 = vmul.f32 %v1020_v49, %v429_v25 }
  0xca   : > { %v494_v30 = vmul.f32 %v490_v15, %v451_v27  ;;  %v495_v24 = vmul.f32 %v491_v16, %v452_v28  ;;  %v496_v31 = vmul.f32 %v492_v17, %v453_v29  ;;  %v497_v23 = vmul.f32 %v493_v18, %v454_v21 }
  0xcb   : > { %v533_v32 = vcombine.low %v451_v27, %v452_v28  ;;  %v534_v26 = vcombine.low %v453_v29, %v454_v21 }
  0xcc   : > { %v502_v33 = vcombine.low %v494_v30, %v495_v24  ;;  %v503_v34 = vcombine.low %v496_v31, %v497_v23 }
  0xcd   : > { %v541_v46 = vrot.slane %v533_v32, %v1059_v35  ;;  %v548_v47 = vrot.slane %v534_v26, %v1059_v35 }
  0xce   : > { %v510_v48 = vrot.slane %v502_v33, %v1059_v35  ;;  %v517_v49 = vrot.slane %v503_v34, %v1059_v35 }
  0xcf   : > { %v549_v36 = vcombine.low %v541_v46, %v548_v47 }
  0xd0   : > { %v518_v37 = vcombine.low %v510_v48, %v517_v49 }
  0xd1   : > { %v556_v38 = vrot.slane %v549_v36, %v1059_v35 }
  0xd2   : > { %v525_v39 = vrot.slane %v518_v37, %v1059_v35 }
  0xd3   : > { %670 = vst.msk [vmem:[%s1073_s23 + $0x2] ss:$4 sm:$0xf] %vm1067_vm6, %v556_v38 }
  0xd4   : > { %669 = vst.msk [vmem:[%s1073_s23 + $0x1] ss:$4 sm:$0xf] %vm1067_vm6, %v525_v39 }
  0xd5   : > { %793 = shalt.err (!%p790_p5)
}
  0xd6   : > { %s794_s29 = scalar_lea.hbm %s1105_s26, 256  ;;  %s798_s6 = scalar_lea.hbm %s1158_s3, 512 }
  0xd7   : > { %p795_p8 = scmp.ne.s32.totalorder %s1105_s26, %s794_s29  ;;  %p799_p1 = scmp.lt.u32.totalorder %s1105_s26, %s1158_s3 }
  0xd8   : > { %p800_p3 = scmp.lt.u32.totalorder %s798_s6, %s794_s29  ;;  %p802_p6 = scmp.lt.u32.totalorder %s794_s29, %s1105_s26 }
  0xd9   : > { %p796_p9 = pnand %p795_p8, %p1169_p12 }
  0xda   : > { %p801_p11 = por %p800_p3, %p799_p1 }
  0xdb   : > { %p797_p0 = pneg %p796_p9 }
  0xdc   : > { %p803_p13 = por %p802_p6, %p801_p11 }
  0xde   : > { %p804_p7 = pnand %p803_p13, %p797_p0 }
  0xe0   : > { %807 = shalt.err (!%p804_p7)
}
  0xe1   : > { %680 = dma.vmem_to_hbm [thread:$0]  (%p1169_p12), %s1107_s19, 256, %s1105_s26, %s561_s16  }
  0xe2 PF: > { %s587_s10 = sand.u32 1, %s834_s12   ;;  %p1170_p10 = scmp.ne.s32.totalorder %s1163_s25, 0 }
  0xe3   : > { %p1171_p2 = scmp.ge.s32.totalorder %s846_s15, 2  ;;  %s588_s11 = scalar_lea.sflag [#allocation4], %s587_s10 }
  0xe5   : > { %p687_p4 = pnand %p1171_p2, %p1170_p10 }
  0xe7   : > { %829 = dma.done.wait (!%p687_p4), %s588_s11, 256  }
  0xe8   : > { %831 = vsyncadd (!%p687_p4), %s588_s11, 4294967040  ;;  %p16_p5 = scmp.ge.s32.totalorder %s898_s18, 4   ;;  %s1172_s12 = smov %s838_s13 }
  0xe9   : > { %s1173_s13 = smov %s842_s14  ;;  %s1174_s14 = smov %s910_s21 }
  0xea   : > { %s1175_s15 = smov %s898_s18  ;;  %18 = sbr.rel (!%p16_p5) target bundleno = 5 (0x5), region = 82 }
  0xf1   :  { %593 = vsyncpa [#allocation3], 1 }
  0xf2   :  { %595 = vsyncpa [#allocation3 + $0x1], 1 }
  0xf3   :  { %596 = vsyncpa [#allocation4], 1 }
  0xf4   :  { %598 = vsyncpa [#allocation4 + $0x1], 1 }

</bundles_post_ra>
